<compile_context>
chip_gen: v6e
topology: v6e:2x2x1
jax: 0.10.0
libtpu: 0.0.40
codegen_flags: <defaults>
</compile_context>

<pallas_src>
import functools

import jax
import jax.numpy as jnp
from jax import lax
from jax.experimental import pallas as pl
from jax.experimental.pallas import tpu as pltpu


def _round_up(x, m):
    return (x + m - 1) // m * m


def _rnn_recurrence_kernel(alpha, tile_t,
                           drive_ref, h0_ref, whh_ref, wout_ref, bout_ref,
                           out_ref, hid_ref,
                           x1_scr, r1_scr):
    """One (batch-block, time-chunk) grid step.

    drive_ref : (TILE_T, Bb, Np)  = alpha*(X[t] @ Wih^T + b_hh)   (precomputed)
    h0_ref    : (Bb, Np)          initial hidden state x1(0)
    whh_ref   : (Np, Np)          alpha * mask * Whh^T
    wout_ref  : (Np, Op)          Wout^T
    bout_ref  : (1, Op)           b_out
    out_ref   : (TILE_T, Bb, Op)
    hid_ref   : (TILE_T, Bb, Np)
    x1_scr/r1_scr : (Bb, Np)      recurrent state carried across time chunks
    """
    tc = pl.program_id(1)  # time-chunk index (serial axis)

    # (Re)initialize the carried state at the start of every batch block.
    @pl.when(tc == 0)
    def _():
        x1_scr[...] = h0_ref[...]
        r1_scr[...] = jnp.tanh(h0_ref[...])

    whh = whh_ref[...]  # resident recurrent weight, hoisted out of the loop
    one_minus_alpha = jnp.float32(1.0 - alpha)

    def body(i, carry):
        x1, r1 = carry
        rec = jnp.dot(r1, whh, preferred_element_type=jnp.float32)   # (Bb, Np) MXU
        x1_new = one_minus_alpha * x1 + rec + drive_ref[i]
        r1_new = jnp.tanh(x1_new)                                    # EUP
        hid_ref[i] = r1_new                                          # lane-dense store
        return (x1_new, r1_new)

    x1_fin, r1_fin = lax.fori_loop(
        0, tile_t, body, (x1_scr[...], r1_scr[...]), unroll=True)
    x1_scr[...] = x1_fin
    r1_scr[...] = r1_fin

    # Output projection batched over the whole time chunk: one dense MXU matmul
    # with a lane-dense O_pad store instead of per-timestep tiny matmuls.
    hid_chunk = hid_ref[...]                        # (TILE_T, Bb, Np)
    tt, bb, npad = hid_chunk.shape
    flat = hid_chunk.reshape(tt * bb, npad)
    out_flat = jnp.dot(flat, wout_ref[...],
                       preferred_element_type=jnp.float32) + bout_ref[...]
    out_ref[...] = out_flat.reshape(out_ref.shape)


@functools.partial(jax.jit, static_argnames=("alpha", "tile_t", "batch_block"))
def rnn_forward(X, h0, W_hh, W_ih, b_hh, W_out, b_out, mask, *, alpha,
                tile_t=8, batch_block=None):
    """X: (T, B, I) float32 (time-major, as in the PyTorch module).
    Returns (out (T, B, O), hiddenl1 (T, B, N))."""
    T, B, I = X.shape
    N = h0.shape[-1]
    O = W_out.shape[0]
    f32 = jnp.float32

    # ---- TPU-friendly padded shapes --------------------------------------
    B_pad = _round_up(B, 8)          # sublane-dense batch
    N_pad = _round_up(N, 128)        # lane-dense hidden dim
    O_pad = _round_up(O, 128)        # lane-dense output dim
    T_pad = _round_up(T, tile_t)
    if batch_block is None:
        batch_block = min(B_pad, 128)
    batch_block = _round_up(batch_block, 8)
    B_pad = _round_up(B_pad, batch_block)

    # ---- Weight prep: pre-mask, fold alpha, pre-transpose, zero-pad --------
    whh_a = alpha * (mask.astype(f32) * W_hh.T.astype(f32))              # (N, N)
    whh_p = jnp.zeros((N_pad, N_pad), f32).at[:N, :N].set(whh_a)
    wout_p = jnp.zeros((N_pad, O_pad), f32).at[:N, :O].set(W_out.T.astype(f32))
    bout_p = jnp.zeros((1, O_pad), f32).at[0, :O].set(b_out.astype(f32))

    # ---- Hoisted input projection (non-recurrent), constants folded --------
    #   drive[t] = alpha * (X[t] @ Wih^T + b_hh)
    drive = alpha * (X.reshape(T * B, I).astype(f32) @ W_ih.T.astype(f32)
                     + b_hh.astype(f32))
    drive = drive.reshape(T, B, N)
    drive_p = jnp.zeros((T_pad, B_pad, N_pad), f32).at[:T, :B, :N].set(drive)

    h0_p = jnp.zeros((B_pad, N_pad), f32).at[:B, :N].set(h0.astype(f32))

    nb = B_pad // batch_block
    nc = T_pad // tile_t

    grid_spec = pltpu.PrefetchScalarGridSpec(
        num_scalar_prefetch=0,
        grid=(nb, nc),
        in_specs=[
            pl.BlockSpec((tile_t, batch_block, N_pad), lambda b, c: (c, b, 0)),  # drive
            pl.BlockSpec((batch_block, N_pad),         lambda b, c: (b, 0)),     # h0
            pl.BlockSpec((N_pad, N_pad),               lambda b, c: (0, 0)),     # alpha*mask*Whh^T
            pl.BlockSpec((N_pad, O_pad),               lambda b, c: (0, 0)),     # Wout^T
            pl.BlockSpec((1, O_pad),                   lambda b, c: (0, 0)),     # b_out
        ],
        out_specs=[
            pl.BlockSpec((tile_t, batch_block, O_pad), lambda b, c: (c, b, 0)),  # out
            pl.BlockSpec((tile_t, batch_block, N_pad), lambda b, c: (c, b, 0)),  # hiddenl1
        ],
        scratch_shapes=[
            pltpu.VMEM((batch_block, N_pad), jnp.float32),   # x1 carried across chunks
            pltpu.VMEM((batch_block, N_pad), jnp.float32),   # r1 carried across chunks
        ],
    )

    out_p, hid_p = pl.pallas_call(
        functools.partial(_rnn_recurrence_kernel, float(alpha), tile_t),
        out_shape=(
            jax.ShapeDtypeStruct((T_pad, B_pad, O_pad), jnp.float32),
            jax.ShapeDtypeStruct((T_pad, B_pad, N_pad), jnp.float32),
        ),
        grid_spec=grid_spec,
        compiler_params=pltpu.CompilerParams(
            # batch blocks independent (megacore-shardable on v7x); time is serial
            dimension_semantics=("parallel", "arbitrary"),
            vmem_limit_bytes=64 * 1024 * 1024),
    )(drive_p, h0_p, whh_p, wout_p, bout_p)

    return out_p[:T, :B, :O], hid_p[:T, :B, :N]


def rnn_reference(X, h0, W_hh, W_ih, b_hh, W_out, b_out, mask, alpha):
    """Pure-JAX reference matching the PyTorch forward semantics exactly."""
    whh_mt = mask * W_hh.T
    wih_t = W_ih.T
    wout_t = W_out.T
    x1 = h0
    r1 = jnp.tanh(x1)
    outs, hids = [], []
    for t in range(X.shape[0]):
        x1 = x1 + alpha * (-x1 + r1 @ whh_mt + X[t] @ wih_t + b_hh)
        r1 = jnp.tanh(x1)
        hids.append(r1)
        outs.append(r1 @ wout_t + b_out)
    return jnp.stack(outs), jnp.stack(hids)


if __name__ == "__main__":
    # Small, forward-consistent shapes (timesteps x batch x ninputs).
    T, B = 8, 4
    n_inputs, n_neurons, n_outputs = 8, 32, 4
    alpha = 0.1
    p_recurrent = 0.8

    key = jax.random.PRNGKey(0)
    kx, kh, k_whh, k_wih, k_bhh, k_wout, k_bout, k_mask = jax.random.split(key, 8)

    X = jax.random.normal(kx, (T, B, n_inputs), dtype=jnp.float32)
    # init_hidden: (rand - 0.5) * 0.2  -> uniform in [-0.1, 0.1)
    h0 = (jax.random.uniform(kh, (B, n_neurons), dtype=jnp.float32) - 0.5) * 0.2

    W_hh = jax.random.normal(k_whh, (n_neurons, n_neurons), jnp.float32) / jnp.sqrt(n_neurons)
    W_ih = jax.random.normal(k_wih, (n_neurons, n_inputs), jnp.float32) / jnp.sqrt(n_inputs)
    b_hh = jax.random.normal(k_bhh, (n_neurons,), jnp.float32) * 0.01
    W_out = jax.random.normal(k_wout, (n_outputs, n_neurons), jnp.float32) / jnp.sqrt(n_neurons)
    b_out = jax.random.normal(k_bout, (n_outputs,), jnp.float32) * 0.01
    mask = (jax.random.uniform(k_mask, (n_neurons, n_neurons)) < p_recurrent).astype(jnp.float32)

    out, hid = rnn_forward(X, h0, W_hh, W_ih, b_hh, W_out, b_out, mask,
                           alpha=alpha, tile_t=8)
    jax.block_until_ready((out, hid))

    out_ref, hid_ref = rnn_reference(X, h0, W_hh, W_ih, b_hh, W_out, b_out, mask, alpha)
    assert out.shape == (T, B, n_outputs) and hid.shape == (T, B, n_neurons)
    assert jnp.allclose(out, out_ref, atol=1e-4, rtol=1e-4), \
        float(jnp.max(jnp.abs(out - out_ref)))
    assert jnp.allclose(hid, hid_ref, atol=1e-4, rtol=1e-4), \
        float(jnp.max(jnp.abs(hid - hid_ref)))

    print("KERNEL_OK")
</pallas_src>

<mosaic_0001>
module attributes {stable_mosaic.version = 11 : i64} {
  func.func @_rnn_recurrence_kernel(%arg0: i32, %arg1: i32, %arg2: memref<8x8x128xf32, #tpu.memory_space<vmem>>, %arg3: memref<8x128xf32, #tpu.memory_space<vmem>>, %arg4: memref<128x128xf32, #tpu.memory_space<vmem>>, %arg5: memref<128x128xf32, #tpu.memory_space<vmem>>, %arg6: memref<1x128xf32, #tpu.memory_space<vmem>>, %arg7: memref<8x8x128xf32, #tpu.memory_space<vmem>>, %arg8: memref<8x8x128xf32, #tpu.memory_space<vmem>>, %arg9: memref<8x128xf32, #tpu.memory_space<vmem>>, %arg10: memref<8x128xf32, #tpu.memory_space<vmem>>) attributes {dimension_semantics = [#tpu.dimension_semantics<parallel>, #tpu.dimension_semantics<arbitrary>], iteration_bounds = array<i64: 1, 1>, scalar_prefetch = 0 : i64, scratch_operands = 2 : i64, tpu.core_type = #tpu.core_type<tc>, window_params = [{transform_indices = @transform_0, window_bounds = array<i64: 8, 8, 128>}, {transform_indices = @transform_1, window_bounds = array<i64: 8, 128>}, {pipeline_mode = #tpu.pipeline_mode<synchronous>, transform_indices = @transform_2, window_bounds = array<i64: 128, 128>}, {pipeline_mode = #tpu.pipeline_mode<synchronous>, transform_indices = @transform_3, window_bounds = array<i64: 128, 128>}, {pipeline_mode = #tpu.pipeline_mode<synchronous>, transform_indices = @transform_4, window_bounds = array<i64: 1, 128>}, {transform_indices = @transform_5, window_bounds = array<i64: 8, 8, 128>}, {transform_indices = @transform_6, window_bounds = array<i64: 8, 8, 128>}]} {
    %c0_i32 = arith.constant 0 : i32
    %0 = arith.cmpi eq, %arg1, %c0_i32 : i32
    %1 = arith.extui %0 : i1 to i32
    %c0_i32_0 = arith.constant 0 : i32
    %2 = arith.cmpi ne, %1, %c0_i32_0 : i32
    scf.if %2 {
      %c0_62 = arith.constant 0 : index
      %c0_63 = arith.constant 0 : index
      %121 = vector.load %arg3[%c0_62, %c0_63] : memref<8x128xf32, #tpu.memory_space<vmem>>, vector<8x128xf32>
      %c0_64 = arith.constant 0 : index
      %c0_65 = arith.constant 0 : index
      %122 = vector.load %arg9[%c0_64, %c0_65] : memref<8x128xf32, #tpu.memory_space<vmem>>, vector<8x128xf32>
      tpu.vector_store %arg9[%c0_64, %c0_65], %121 {strides = array<i32>} : memref<8x128xf32, #tpu.memory_space<vmem>>, vector<8x128xf32>,
      %c0_66 = arith.constant 0 : index
      %c0_67 = arith.constant 0 : index
      %123 = vector.load %arg3[%c0_66, %c0_67] : memref<8x128xf32, #tpu.memory_space<vmem>>, vector<8x128xf32>
      %124 = math.tanh %123 : vector<8x128xf32>
      %c0_68 = arith.constant 0 : index
      %c0_69 = arith.constant 0 : index
      %125 = vector.load %arg10[%c0_68, %c0_69] : memref<8x128xf32, #tpu.memory_space<vmem>>, vector<8x128xf32>
      tpu.vector_store %arg10[%c0_68, %c0_69], %124 {strides = array<i32>} : memref<8x128xf32, #tpu.memory_space<vmem>>, vector<8x128xf32>,
    } else {
    }
    %c0 = arith.constant 0 : index
    %c0_1 = arith.constant 0 : index
    %3 = vector.load %arg4[%c0, %c0_1] : memref<128x128xf32, #tpu.memory_space<vmem>>, vector<128x128xf32>
    %c0_2 = arith.constant 0 : index
    %c0_3 = arith.constant 0 : index
    %4 = vector.load %arg9[%c0_2, %c0_3] : memref<8x128xf32, #tpu.memory_space<vmem>>, vector<8x128xf32>
    %c0_4 = arith.constant 0 : index
    %c0_5 = arith.constant 0 : index
    %5 = vector.load %arg10[%c0_4, %c0_5] : memref<8x128xf32, #tpu.memory_space<vmem>>, vector<8x128xf32>
    %cst = arith.constant 0.899999976 : f32
    %c0_i32_6 = arith.constant 0 : i32
    %cst_7 = arith.constant dense<0.000000e+00> : vector<8x128xf32>
    %6 = tpu.matmul %5, %3, %cst_7 {dimension_numbers = #tpu.dot_dimension_numbers<[1], [0], [0], [1], [0, 0, 1, 1], [], []>} : vector<8x128xf32>, vector<128x128xf32>, vector<8x128xf32> -> vector<8x128xf32>
    %7 = vector.broadcast %cst : f32 to vector<8x128xf32>
    %8 = arith.mulf %7, %4 : vector<8x128xf32>
    %9 = arith.addf %8, %6 : vector<8x128xf32>
    %10 = arith.index_cast %c0_i32_6 : i32 to index
    %c0_8 = arith.constant 0 : index
    %c0_9 = arith.constant 0 : index
    %11 = vector.load %arg2[%10, %c0_8, %c0_9] : memref<8x8x128xf32, #tpu.memory_space<vmem>>, vector<1x8x128xf32>
    %12 = vector.shape_cast %11 : vector<1x8x128xf32> to vector<8x128xf32>
    %13 = arith.addf %9, %12 : vector<8x128xf32>
    %14 = math.tanh %13 : vector<8x128xf32>
    %15 = arith.index_cast %c0_i32_6 : i32 to index
    %c0_10 = arith.constant 0 : index
    %c0_11 = arith.constant 0 : index
    %16 = vector.load %arg8[%15, %c0_10, %c0_11] : memref<8x8x128xf32, #tpu.memory_space<vmem>>, vector<1x8x128xf32>
    %17 = vector.shape_cast %16 : vector<1x8x128xf32> to vector<8x128xf32>
    %18 = vector.shape_cast %14 : vector<8x128xf32> to vector<1x8x128xf32>
    tpu.vector_store %arg8[%15, %c0_10, %c0_11], %18 {strides = array<i32>} : memref<8x8x128xf32, #tpu.memory_space<vmem>>, vector<1x8x128xf32>,
    %c1_i32 = arith.constant 1 : i32
    %cst_12 = arith.constant dense<0.000000e+00> : vector<8x128xf32>
    %19 = tpu.matmul %14, %3, %cst_12 {dimension_numbers = #tpu.dot_dimension_numbers<[1], [0], [0], [1], [0, 0, 1, 1], [], []>} : vector<8x128xf32>, vector<128x128xf32>, vector<8x128xf32> -> vector<8x128xf32>
    %20 = vector.broadcast %cst : f32 to vector<8x128xf32>
    %21 = arith.mulf %20, %13 : vector<8x128xf32>
    %22 = arith.addf %21, %19 : vector<8x128xf32>
    %23 = arith.index_cast %c1_i32 : i32 to index
    %c0_13 = arith.constant 0 : index
    %c0_14 = arith.constant 0 : index
    %24 = vector.load %arg2[%23, %c0_13, %c0_14] : memref<8x8x128xf32, #tpu.memory_space<vmem>>, vector<1x8x128xf32>
    %25 = vector.shape_cast %24 : vector<1x8x128xf32> to vector<8x128xf32>
    %26 = arith.addf %22, %25 : vector<8x128xf32>
    %27 = math.tanh %26 : vector<8x128xf32>
    %28 = arith.index_cast %c1_i32 : i32 to index
    %c0_15 = arith.constant 0 : index
    %c0_16 = arith.constant 0 : index
    %29 = vector.load %arg8[%28, %c0_15, %c0_16] : memref<8x8x128xf32, #tpu.memory_space<vmem>>, vector<1x8x128xf32>
    %30 = vector.shape_cast %29 : vector<1x8x128xf32> to vector<8x128xf32>
    %31 = vector.shape_cast %27 : vector<8x128xf32> to vector<1x8x128xf32>
    tpu.vector_store %arg8[%28, %c0_15, %c0_16], %31 {strides = array<i32>} : memref<8x8x128xf32, #tpu.memory_space<vmem>>, vector<1x8x128xf32>,
    %c2_i32 = arith.constant 2 : i32
    %cst_17 = arith.constant dense<0.000000e+00> : vector<8x128xf32>
    %32 = tpu.matmul %27, %3, %cst_17 {dimension_numbers = #tpu.dot_dimension_numbers<[1], [0], [0], [1], [0, 0, 1, 1], [], []>} : vector<8x128xf32>, vector<128x128xf32>, vector<8x128xf32> -> vector<8x128xf32>
    %33 = vector.broadcast %cst : f32 to vector<8x128xf32>
    %34 = arith.mulf %33, %26 : vector<8x128xf32>
    %35 = arith.addf %34, %32 : vector<8x128xf32>
    %36 = arith.index_cast %c2_i32 : i32 to index
    %c0_18 = arith.constant 0 : index
    %c0_19 = arith.constant 0 : index
    %37 = vector.load %arg2[%36, %c0_18, %c0_19] : memref<8x8x128xf32, #tpu.memory_space<vmem>>, vector<1x8x128xf32>
    %38 = vector.shape_cast %37 : vector<1x8x128xf32> to vector<8x128xf32>
    %39 = arith.addf %35, %38 : vector<8x128xf32>
    %40 = math.tanh %39 : vector<8x128xf32>
    %41 = arith.index_cast %c2_i32 : i32 to index
    %c0_20 = arith.constant 0 : index
    %c0_21 = arith.constant 0 : index
    %42 = vector.load %arg8[%41, %c0_20, %c0_21] : memref<8x8x128xf32, #tpu.memory_space<vmem>>, vector<1x8x128xf32>
    %43 = vector.shape_cast %42 : vector<1x8x128xf32> to vector<8x128xf32>
    %44 = vector.shape_cast %40 : vector<8x128xf32> to vector<1x8x128xf32>
    tpu.vector_store %arg8[%41, %c0_20, %c0_21], %44 {strides = array<i32>} : memref<8x8x128xf32, #tpu.memory_space<vmem>>, vector<1x8x128xf32>,
    %c3_i32 = arith.constant 3 : i32
    %cst_22 = arith.constant dense<0.000000e+00> : vector<8x128xf32>
    %45 = tpu.matmul %40, %3, %cst_22 {dimension_numbers = #tpu.dot_dimension_numbers<[1], [0], [0], [1], [0, 0, 1, 1], [], []>} : vector<8x128xf32>, vector<128x128xf32>, vector<8x128xf32> -> vector<8x128xf32>
    %46 = vector.broadcast %cst : f32 to vector<8x128xf32>
    %47 = arith.mulf %46, %39 : vector<8x128xf32>
    %48 = arith.addf %47, %45 : vector<8x128xf32>
    %49 = arith.index_cast %c3_i32 : i32 to index
    %c0_23 = arith.constant 0 : index
    %c0_24 = arith.constant 0 : index
    %50 = vector.load %arg2[%49, %c0_23, %c0_24] : memref<8x8x128xf32, #tpu.memory_space<vmem>>, vector<1x8x128xf32>
    %51 = vector.shape_cast %50 : vector<1x8x128xf32> to vector<8x128xf32>
    %52 = arith.addf %48, %51 : vector<8x128xf32>
    %53 = math.tanh %52 : vector<8x128xf32>
    %54 = arith.index_cast %c3_i32 : i32 to index
    %c0_25 = arith.constant 0 : index
    %c0_26 = arith.constant 0 : index
    %55 = vector.load %arg8[%54, %c0_25, %c0_26] : memref<8x8x128xf32, #tpu.memory_space<vmem>>, vector<1x8x128xf32>
    %56 = vector.shape_cast %55 : vector<1x8x128xf32> to vector<8x128xf32>
    %57 = vector.shape_cast %53 : vector<8x128xf32> to vector<1x8x128xf32>
    tpu.vector_store %arg8[%54, %c0_25, %c0_26], %57 {strides = array<i32>} : memref<8x8x128xf32, #tpu.memory_space<vmem>>, vector<1x8x128xf32>,
    %c4_i32 = arith.constant 4 : i32
    %cst_27 = arith.constant dense<0.000000e+00> : vector<8x128xf32>
    %58 = tpu.matmul %53, %3, %cst_27 {dimension_numbers = #tpu.dot_dimension_numbers<[1], [0], [0], [1], [0, 0, 1, 1], [], []>} : vector<8x128xf32>, vector<128x128xf32>, vector<8x128xf32> -> vector<8x128xf32>
    %59 = vector.broadcast %cst : f32 to vector<8x128xf32>
    %60 = arith.mulf %59, %52 : vector<8x128xf32>
    %61 = arith.addf %60, %58 : vector<8x128xf32>
    %62 = arith.index_cast %c4_i32 : i32 to index
    %c0_28 = arith.constant 0 : index
    %c0_29 = arith.constant 0 : index
    %63 = vector.load %arg2[%62, %c0_28, %c0_29] : memref<8x8x128xf32, #tpu.memory_space<vmem>>, vector<1x8x128xf32>
    %64 = vector.shape_cast %63 : vector<1x8x128xf32> to vector<8x128xf32>
    %65 = arith.addf %61, %64 : vector<8x128xf32>
    %66 = math.tanh %65 : vector<8x128xf32>
    %67 = arith.index_cast %c4_i32 : i32 to index
    %c0_30 = arith.constant 0 : index
    %c0_31 = arith.constant 0 : index
    %68 = vector.load %arg8[%67, %c0_30, %c0_31] : memref<8x8x128xf32, #tpu.memory_space<vmem>>, vector<1x8x128xf32>
    %69 = vector.shape_cast %68 : vector<1x8x128xf32> to vector<8x128xf32>
    %70 = vector.shape_cast %66 : vector<8x128xf32> to vector<1x8x128xf32>
    tpu.vector_store %arg8[%67, %c0_30, %c0_31], %70 {strides = array<i32>} : memref<8x8x128xf32, #tpu.memory_space<vmem>>, vector<1x8x128xf32>,
    %c5_i32 = arith.constant 5 : i32
    %cst_32 = arith.constant dense<0.000000e+00> : vector<8x128xf32>
    %71 = tpu.matmul %66, %3, %cst_32 {dimension_numbers = #tpu.dot_dimension_numbers<[1], [0], [0], [1], [0, 0, 1, 1], [], []>} : vector<8x128xf32>, vector<128x128xf32>, vector<8x128xf32> -> vector<8x128xf32>
    %72 = vector.broadcast %cst : f32 to vector<8x128xf32>
    %73 = arith.mulf %72, %65 : vector<8x128xf32>
    %74 = arith.addf %73, %71 : vector<8x128xf32>
    %75 = arith.index_cast %c5_i32 : i32 to index
    %c0_33 = arith.constant 0 : index
    %c0_34 = arith.constant 0 : index
    %76 = vector.load %arg2[%75, %c0_33, %c0_34] : memref<8x8x128xf32, #tpu.memory_space<vmem>>, vector<1x8x128xf32>
    %77 = vector.shape_cast %76 : vector<1x8x128xf32> to vector<8x128xf32>
    %78 = arith.addf %74, %77 : vector<8x128xf32>
    %79 = math.tanh %78 : vector<8x128xf32>
    %80 = arith.index_cast %c5_i32 : i32 to index
    %c0_35 = arith.constant 0 : index
    %c0_36 = arith.constant 0 : index
    %81 = vector.load %arg8[%80, %c0_35, %c0_36] : memref<8x8x128xf32, #tpu.memory_space<vmem>>, vector<1x8x128xf32>
    %82 = vector.shape_cast %81 : vector<1x8x128xf32> to vector<8x128xf32>
    %83 = vector.shape_cast %79 : vector<8x128xf32> to vector<1x8x128xf32>
    tpu.vector_store %arg8[%80, %c0_35, %c0_36], %83 {strides = array<i32>} : memref<8x8x128xf32, #tpu.memory_space<vmem>>, vector<1x8x128xf32>,
    %c6_i32 = arith.constant 6 : i32
    %cst_37 = arith.constant dense<0.000000e+00> : vector<8x128xf32>
    %84 = tpu.matmul %79, %3, %cst_37 {dimension_numbers = #tpu.dot_dimension_numbers<[1], [0], [0], [1], [0, 0, 1, 1], [], []>} : vector<8x128xf32>, vector<128x128xf32>, vector<8x128xf32> -> vector<8x128xf32>
    %85 = vector.broadcast %cst : f32 to vector<8x128xf32>
    %86 = arith.mulf %85, %78 : vector<8x128xf32>
    %87 = arith.addf %86, %84 : vector<8x128xf32>
    %88 = arith.index_cast %c6_i32 : i32 to index
    %c0_38 = arith.constant 0 : index
    %c0_39 = arith.constant 0 : index
    %89 = vector.load %arg2[%88, %c0_38, %c0_39] : memref<8x8x128xf32, #tpu.memory_space<vmem>>, vector<1x8x128xf32>
    %90 = vector.shape_cast %89 : vector<1x8x128xf32> to vector<8x128xf32>
    %91 = arith.addf %87, %90 : vector<8x128xf32>
    %92 = math.tanh %91 : vector<8x128xf32>
    %93 = arith.index_cast %c6_i32 : i32 to index
    %c0_40 = arith.constant 0 : index
    %c0_41 = arith.constant 0 : index
    %94 = vector.load %arg8[%93, %c0_40, %c0_41] : memref<8x8x128xf32, #tpu.memory_space<vmem>>, vector<1x8x128xf32>
    %95 = vector.shape_cast %94 : vector<1x8x128xf32> to vector<8x128xf32>
    %96 = vector.shape_cast %92 : vector<8x128xf32> to vector<1x8x128xf32>
    tpu.vector_store %arg8[%93, %c0_40, %c0_41], %96 {strides = array<i32>} : memref<8x8x128xf32, #tpu.memory_space<vmem>>, vector<1x8x128xf32>,
    %c7_i32 = arith.constant 7 : i32
    %cst_42 = arith.constant dense<0.000000e+00> : vector<8x128xf32>
    %97 = tpu.matmul %92, %3, %cst_42 {dimension_numbers = #tpu.dot_dimension_numbers<[1], [0], [0], [1], [0, 0, 1, 1], [], []>} : vector<8x128xf32>, vector<128x128xf32>, vector<8x128xf32> -> vector<8x128xf32>
    %98 = vector.broadcast %cst : f32 to vector<8x128xf32>
    %99 = arith.mulf %98, %91 : vector<8x128xf32>
    %100 = arith.addf %99, %97 : vector<8x128xf32>
    %101 = arith.index_cast %c7_i32 : i32 to index
    %c0_43 = arith.constant 0 : index
    %c0_44 = arith.constant 0 : index
    %102 = vector.load %arg2[%101, %c0_43, %c0_44] : memref<8x8x128xf32, #tpu.memory_space<vmem>>, vector<1x8x128xf32>
    %103 = vector.shape_cast %102 : vector<1x8x128xf32> to vector<8x128xf32>
    %104 = arith.addf %100, %103 : vector<8x128xf32>
    %105 = math.tanh %104 : vector<8x128xf32>
    %106 = arith.index_cast %c7_i32 : i32 to index
    %c0_45 = arith.constant 0 : index
    %c0_46 = arith.constant 0 : index
    %107 = vector.load %arg8[%106, %c0_45, %c0_46] : memref<8x8x128xf32, #tpu.memory_space<vmem>>, vector<1x8x128xf32>
    %108 = vector.shape_cast %107 : vector<1x8x128xf32> to vector<8x128xf32>
    %109 = vector.shape_cast %105 : vector<8x128xf32> to vector<1x8x128xf32>
    tpu.vector_store %arg8[%106, %c0_45, %c0_46], %109 {strides = array<i32>} : memref<8x8x128xf32, #tpu.memory_space<vmem>>, vector<1x8x128xf32>,
    %c8_i32 = arith.constant 8 : i32
    %c0_47 = arith.constant 0 : index
    %c0_48 = arith.constant 0 : index
    %110 = vector.load %arg9[%c0_47, %c0_48] : memref<8x128xf32, #tpu.memory_space<vmem>>, vector<8x128xf32>
    tpu.vector_store %arg9[%c0_47, %c0_48], %104 {strides = array<i32>} : memref<8x128xf32, #tpu.memory_space<vmem>>, vector<8x128xf32>,
    %c0_49 = arith.constant 0 : index
    %c0_50 = arith.constant 0 : index
    %111 = vector.load %arg10[%c0_49, %c0_50] : memref<8x128xf32, #tpu.memory_space<vmem>>, vector<8x128xf32>
    tpu.vector_store %arg10[%c0_49, %c0_50], %105 {strides = array<i32>} : memref<8x128xf32, #tpu.memory_space<vmem>>, vector<8x128xf32>,
    %c0_51 = arith.constant 0 : index
    %c0_52 = arith.constant 0 : index
    %c0_53 = arith.constant 0 : index
    %112 = vector.load %arg8[%c0_51, %c0_52, %c0_53] : memref<8x8x128xf32, #tpu.memory_space<vmem>>, vector<8x8x128xf32>
    %113 = vector.shape_cast %112 : vector<8x8x128xf32> to vector<64x128xf32>
    %c0_54 = arith.constant 0 : index
    %c0_55 = arith.constant 0 : index
    %114 = vector.load %arg5[%c0_54, %c0_55] : memref<128x128xf32, #tpu.memory_space<vmem>>, vector<128x128xf32>
    %cst_56 = arith.constant dense<0.000000e+00> : vector<64x128xf32>
    %115 = tpu.matmul %113, %114, %cst_56 {dimension_numbers = #tpu.dot_dimension_numbers<[1], [0], [0], [1], [0, 0, 1, 1], [], []>} : vector<64x128xf32>, vector<128x128xf32>, vector<64x128xf32> -> vector<64x128xf32>
    %c0_57 = arith.constant 0 : index
    %c0_58 = arith.constant 0 : index
    %116 = vector.load %arg6[%c0_57, %c0_58] : memref<1x128xf32, #tpu.memory_space<vmem>>, vector<1x128xf32>
    %117 = vector.broadcast %116 : vector<1x128xf32> to vector<64x128xf32>
    %118 = arith.addf %115, %117 : vector<64x128xf32>
    %119 = vector.shape_cast %118 : vector<64x128xf32> to vector<8x8x128xf32>
    %c0_59 = arith.constant 0 : index
    %c0_60 = arith.constant 0 : index
    %c0_61 = arith.constant 0 : index
    %120 = vector.load %arg7[%c0_59, %c0_60, %c0_61] : memref<8x8x128xf32, #tpu.memory_space<vmem>>, vector<8x8x128xf32>
    tpu.vector_store %arg7[%c0_59, %c0_60, %c0_61], %119 {strides = array<i32>} : memref<8x8x128xf32, #tpu.memory_space<vmem>>, vector<8x8x128xf32>,
    return
  }
  func.func @transform_0(%arg0: i32, %arg1: i32) -> (i32, i32, i32) {
    %c0_i32 = arith.constant 0 : i32
    %c0_i32_0 = arith.constant 0 : i32
    return %arg1, %arg0, %c0_i32 : i32, i32, i32
  }
  func.func @transform_1(%arg0: i32, %arg1: i32) -> (i32, i32) {
    %c0_i32 = arith.constant 0 : i32
    %c0_i32_0 = arith.constant 0 : i32
    return %arg0, %c0_i32 : i32, i32
  }
  func.func @transform_2(%arg0: i32, %arg1: i32) -> (i32, i32) {
    %c0_i32 = arith.constant 0 : i32
    %c0_i32_0 = arith.constant 0 : i32
    %c0_i32_1 = arith.constant 0 : i32
    return %c0_i32, %c0_i32_0 : i32, i32
  }
  func.func @transform_3(%arg0: i32, %arg1: i32) -> (i32, i32) {
    %c0_i32 = arith.constant 0 : i32
    %c0_i32_0 = arith.constant 0 : i32
    %c0_i32_1 = arith.constant 0 : i32
    return %c0_i32, %c0_i32_0 : i32, i32
  }
  func.func @transform_4(%arg0: i32, %arg1: i32) -> (i32, i32) {
    %c0_i32 = arith.constant 0 : i32
    %c0_i32_0 = arith.constant 0 : i32
    %c0_i32_1 = arith.constant 0 : i32
    return %c0_i32, %c0_i32_0 : i32, i32
  }
  func.func @transform_5(%arg0: i32, %arg1: i32) -> (i32, i32, i32) {
    %c0_i32 = arith.constant 0 : i32
    %c0_i32_0 = arith.constant 0 : i32
    return %arg1, %arg0, %c0_i32 : i32, i32, i32
  }
  func.func @transform_6(%arg0: i32, %arg1: i32) -> (i32, i32, i32) {
    %c0_i32 = arith.constant 0 : i32
    %c0_i32_0 = arith.constant 0 : i32
    return %arg1, %arg0, %c0_i32 : i32, i32, i32
  }
}

</mosaic_0001>

<bundles_post_ra>
// kernel: rnn_forward.1
= control target key start
LH: loop header
LB: loop body
LE: loop exit
PB: predicated region body
PF: predicated region fallthrough
CT: control target
= control target key end

     0   :  { %v1344_v0 = vmov 0.0   ;;  %vm1345_vm0 = vmmov 0   ;;  %s1888_s2 = inlined_call_operand.vmem [shape: f32[128,128], index: 2, kind: input, shape index: {}]   ;;  %s1889_s1 = inlined_call_operand.vmem [shape: f32[8,128], index: 1, kind: input, shape index: {}]   ;;  %s1890_s0 = inlined_call_operand.vmem [shape: f32[8,8,128], index: 0, kind: input, shape index: {}]   ;;  %s1891_s6 = inlined_call_operand.vmem [shape: f32[8,8,128], index: 6, kind: output, shape index: {1}]   ;;  %s1892_s3 = inlined_call_operand.vmem [shape: f32[128,128], index: 3, kind: input, shape index: {}]   ;;  %s1893_s4 = inlined_call_operand.vmem [shape: f32[1,128], index: 4, kind: input, shape index: {}]   ;;  %s1894_s5 = inlined_call_operand.vmem [shape: f32[8,8,128], index: 5, kind: output, shape index: {0}]  }
   0x1   :  { %1000 = vmatprep.subr.mxu1 %v1344_v0  ;;  %v1385_v1 = vld [vmem:[%s1888_s2 + $0x78] sm:$0xff]  ;;  %v1390_v2 = vld [vmem:[%s1888_s2 + $0x70] sm:$0xff]  ;;  %1032 = vmatprep.mubr.msk.f32.mxu1 %vm1345_vm0, %v1344_v0  ;;  %v1400_v3 = vld [vmem:[%s1888_s2 + $0x68] sm:$0xff] }
   0x2   :  { %1001 = vmatpush3.msra.mxu1 %v1385_v1  ;;  %1070 = vmatprep.subr.mxu0 %v1344_v0  ;;  %v1409_v4 = vld [vmem:[%s1888_s2 + $0x60] sm:$0xff]  ;;  %v1418_v5 = vld [vmem:[%s1888_s2 + $0x58] sm:$0xff]  ;;  %v1427_v6 = vld [vmem:[%s1888_s2 + $0x50] sm:$0xff] }
   0x3   :  { %1002 = vmatprep.subr.mxu1 %v1344_v0  ;;  %1071 = vmatpush3.msra.mxu0 %v1385_v1  ;;  %v1436_v7 = vld [vmem:[%s1888_s2 + $0x48] sm:$0xff]  ;;  %v1445_v8 = vld [vmem:[%s1888_s2 + $0x40] sm:$0xff]  ;;  %v1459_v10 = vld [vmem:[%s1888_s2 + $0x38] sm:$0xff] }
   0x4   :  { %1003 = vmatpush3.msra.mxu1 %v1390_v2  ;;  %1072 = vmatprep.subr.mxu0 %v1344_v0  ;;  %v1452_v9 = vld [vmem:[%s1889_s1] sm:$0xff]  ;;  %v1468_v11 = vld [vmem:[%s1888_s2 + $0x30] sm:$0xff]  ;;  %v1478_v12 = vld [vmem:[%s1888_s2 + $0x28] sm:$0xff] }
   0x5   :  { %1004 = vmatprep.subr.mxu1 %v1344_v0  ;;  %1073 = vmatpush3.msra.mxu0 %v1390_v2  ;;  %1326 = vtanh.f32 %v1452_v9  ;;  %v1487_v13 = vld [vmem:[%s1888_s2 + $0x20] sm:$0xff]  ;;  %v1496_v14 = vld [vmem:[%s1888_s2 + $0x18] sm:$0xff]  ;;  %v1505_v15 = vld [vmem:[%s1888_s2 + $0x10] sm:$0xff]  ;;  %v119_v19 = vmul.f32 0.9, %v1452_v9 }
   0x6   :  { %1005 = vmatpush3.msra.mxu1 %v1400_v3  ;;  %1074 = vmatprep.subr.mxu0 %v1344_v0  ;;  %v1514_v16 = vld [vmem:[%s1888_s2 + $0x8] sm:$0xff]  ;;  %v1523_v17 = vld [vmem:[%s1888_s2] sm:$0xff]  ;;  %v827_v35 = vld [vmem:[%s1890_s0 + $0x10] sm:$0xff] }
   0x7   :  { %1006 = vmatprep.subr.mxu1 %v1344_v0  ;;  %1075 = vmatpush3.msra.mxu0 %v1400_v3  ;;  %v121_v21 = vld [vmem:[%s1890_s0] sm:$0xff]  ;;  %v825_v28 = vld [vmem:[%s1890_s0 + $0x8] sm:$0xff]  ;;  %v829_v42 = vld [vmem:[%s1890_s0 + $0x18] sm:$0xff] }
   0x8   :  { %1007 = vmatpush3.msra.mxu1 %v1409_v4  ;;  %1076 = vmatprep.subr.mxu0 %v1344_v0  ;;  %v831_v49 = vld [vmem:[%s1890_s0 + $0x20] sm:$0xff]  ;;  %v696_v54 = vld [vmem:[%s1892_s3 + $0x78] sm:$0xff]  ;;  %v833_v57 = vld [vmem:[%s1890_s0 + $0x28] sm:$0xff] }
   0x9   :  { %1008 = vmatprep.subr.mxu1 %v1344_v0  ;;  %1077 = vmatpush3.msra.mxu0 %v1409_v4  ;;  %v695_v62 = vld [vmem:[%s1892_s3 + $0x70] sm:$0xff]  ;;  %v694_v63 = vld [vmem:[%s1892_s3 + $0x68] sm:$0xff]  ;;  %v684_v9 = vld [vmem:[%s1892_s3 + $0x18] sm:$0xff] }
   0xa   :  { %1009 = vmatpush3.msra.mxu1 %v1418_v5  ;;  %1078 = vmatprep.subr.mxu0 %v1344_v0 }
   0xb   :  { %1010 = vmatprep.subr.mxu1 %v1344_v0  ;;  %1079 = vmatpush3.msra.mxu0 %v1418_v5 }
   0xc   :  { %1011 = vmatpush3.msra.mxu1 %v1427_v6  ;;  %1080 = vmatprep.subr.mxu0 %v1344_v0 }
   0xd   :  { %1012 = vmatprep.subr.mxu1 %v1344_v0  ;;  %1081 = vmatpush3.msra.mxu0 %v1427_v6 }
   0xe   :  { %1013 = vmatpush3.msra.mxu1 %v1436_v7  ;;  %1082 = vmatprep.subr.mxu0 %v1344_v0 }
   0xf   :  { %1014 = vmatprep.subr.mxu1 %v1344_v0  ;;  %1083 = vmatpush3.msra.mxu0 %v1436_v7 }
  0x10   :  { %1015 = vmatpush3.msra.mxu1 %v1445_v8  ;;  %1084 = vmatprep.subr.mxu0 %v1344_v0 }
  0x11   :  { %1016 = vmatprep.subr.mxu1 %v1344_v0  ;;  %1085 = vmatpush3.msra.mxu0 %v1445_v8 }
  0x12   :  { %1017 = vmatpush3.msra.mxu1 %v1459_v10  ;;  %1086 = vmatprep.subr.mxu0 %v1344_v0  ;;  %v1327_v18 = vpop.eup %1326 }
  0x13   :  { %1018 = vmatprep.subr.mxu1 %v1344_v0  ;;  %1087 = vmatpush3.msra.mxu0 %v1459_v10 }
  0x14   :  { %1019 = vmatpush3.msra.mxu1 %v1468_v11  ;;  %1088 = vmatprep.subr.mxu0 %v1344_v0 }
  0x15   :  { %1020 = vmatprep.subr.mxu1 %v1344_v0  ;;  %1089 = vmatpush3.msra.mxu0 %v1468_v11 }
  0x16   :  { %1021 = vmatpush3.msra.mxu1 %v1478_v12  ;;  %1090 = vmatprep.subr.mxu0 %v1344_v0 }
  0x17   :  { %1022 = vmatprep.subr.mxu1 %v1344_v0  ;;  %1091 = vmatpush3.msra.mxu0 %v1478_v12 }
  0x18   :  { %1023 = vmatpush3.msra.mxu1 %v1487_v13  ;;  %1092 = vmatprep.subr.mxu0 %v1344_v0 }
  0x19   :  { %1024 = vmatprep.subr.mxu1 %v1344_v0  ;;  %1093 = vmatpush3.msra.mxu0 %v1487_v13 }
  0x1a   :  { %1025 = vmatpush3.msra.mxu1 %v1496_v14  ;;  %1094 = vmatprep.subr.mxu0 %v1344_v0 }
  0x1b   :  { %1026 = vmatprep.subr.mxu1 %v1344_v0  ;;  %1095 = vmatpush3.msra.mxu0 %v1496_v14 }
  0x1c   :  { %1027 = vmatpush3.msra.mxu1 %v1505_v15  ;;  %1096 = vmatprep.subr.mxu0 %v1344_v0 }
  0x1d   :  { %1028 = vmatprep.subr.mxu1 %v1344_v0  ;;  %1097 = vmatpush3.msra.mxu0 %v1505_v15 }
  0x1e   :  { %1029 = vmatpush3.msra.mxu1 %v1514_v16  ;;  %1098 = vmatprep.subr.mxu0 %v1344_v0 }
  0x1f   :  { %1030 = vmatprep.subr.mxu1 %v1344_v0  ;;  %1099 = vmatpush3.msra.mxu0 %v1514_v16 }
  0x20   :  { %1031 = vmatpush3.msra.mxu1 %v1523_v17  ;;  %1100 = vmatprep.subr.mxu0 %v1344_v0 }
  0x21   :  { %1033 = vmatmul.mubr.f32.vlgmr.msra.gmra.mxu1 %v1327_v18  ;;  %1035 = vmatprep.subr.mxu1 %v1344_v0 }
  0x22   :  { %1036 = vmatpush3.msra.mxu1 %v1385_v1  ;;  %1067 = vmatprep.mubr.msk.f32.mxu1 %vm1345_vm0, %v1344_v0 }
  0x23   :  { %1037 = vmatprep.subr.mxu1 %v1344_v0  ;;  %1101 = vmatpush3.msra.mxu0 %v1523_v17 }
  0x24   :  { %1038 = vmatpush3.msra.mxu1 %v1390_v2  ;;  %1102 = vmatprep.mubr.msk.f32.mxu0 %vm1345_vm0, %v1344_v0 }
  0x25   :  { %1039 = vmatprep.subr.mxu1 %v1344_v0  ;;  %1140 = vmatprep.subr.mxu0 %v1344_v0 }
  0x26   :  { %1040 = vmatpush3.msra.mxu1 %v1400_v3 }
  0x27   :  { %1041 = vmatprep.subr.mxu1 %v1344_v0 }
  0x28   :  { %1042 = vmatpush3.msra.mxu1 %v1409_v4 }
  0x29   :  { %1043 = vmatprep.subr.mxu1 %v1344_v0 }
  0x2a   :  { %1044 = vmatpush3.msra.mxu1 %v1418_v5 }
  0x2b   :  { %1045 = vmatprep.subr.mxu1 %v1344_v0 }
  0x2c   :  { %1046 = vmatpush3.msra.mxu1 %v1427_v6 }
  0x2d   :  { %1047 = vmatprep.subr.mxu1 %v1344_v0 }
  0x2e   :  { %1048 = vmatpush3.msra.mxu1 %v1436_v7 }
  0x2f   :  { %1049 = vmatprep.subr.mxu1 %v1344_v0 }
  0x30   :  { %1050 = vmatpush3.msra.mxu1 %v1445_v8 }
  0x31   :  { %1051 = vmatprep.subr.mxu1 %v1344_v0 }
  0x32   :  { %1052 = vmatpush3.msra.mxu1 %v1459_v10 }
  0x33   :  { %1053 = vmatprep.subr.mxu1 %v1344_v0 }
  0x34   :  { %1054 = vmatpush3.msra.mxu1 %v1468_v11 }
  0x35   :  { %1055 = vmatprep.subr.mxu1 %v1344_v0 }
  0x36   :  { %1056 = vmatpush3.msra.mxu1 %v1478_v12 }
  0x37   :  { %1057 = vmatprep.subr.mxu1 %v1344_v0 }
  0x38   :  { %1058 = vmatpush3.msra.mxu1 %v1487_v13 }
  0x39   :  { %1059 = vmatprep.subr.mxu1 %v1344_v0 }
  0x3a   :  { %1060 = vmatpush3.msra.mxu1 %v1496_v14 }
  0x3b   :  { %1061 = vmatprep.subr.mxu1 %v1344_v0 }
  0x3c   :  { %1062 = vmatpush3.msra.mxu1 %v1505_v15 }
  0x3d   :  { %1063 = vmatprep.subr.mxu1 %v1344_v0 }
  0x3e   :  { %1064 = vmatpush3.msra.mxu1 %v1514_v16 }
  0x3f   :  { %1065 = vmatprep.subr.mxu1 %v1344_v0 }
  0x40   :  { %1066 = vmatpush3.msra.mxu1 %v1523_v17 }
  0x41   :  { %1105 = vmatprep.subr.mxu1 %v1344_v0 }
  0xe1   :  { %v115_v20 = vpop.f32.mrf.mxu1 }
  0xe2   :  { %v120_v22 = vadd.f32 %v119_v19, %v115_v20  ;;  %v839_v20 = vld [vmem:[%s1893_s4] ss:$0 sm:$0xff] }
  0xe3   :  { %v1034_v23 = vpop.f32.mrf.mxu1 }
  0xe4   :  { %v122_v24 = vadd.f32 %v121_v21, %v120_v22 }
  0xe6   :  { %1328 = vtanh.f32 %v122_v24  ;;  %v195_v26 = vmul.f32 0.9, %v122_v24 }
  0xf3   :  { %v1575_v25 = vpop.eup %1328 }
  0xf4   :  { %124 = vst [vmem:[%s1891_s6] sm:$0xff] %v1575_v25  ;;  %1068 = vmatmul.mubr.f32.vlgmr.msra.gmra.mxu1 %v1575_v25 }
  0xf5   :  { %1106 = vmatpush3.msra.mxu1 %v1385_v1  ;;  %1137 = vmatprep.mubr.msk.f32.mxu1 %vm1345_vm0, %v1344_v0 }
  0xf6   :  { %1107 = vmatprep.subr.mxu1 %v1344_v0 }
  0xf7   :  { %1108 = vmatpush3.msra.mxu1 %v1390_v2 }
  0xf8   :  { %1109 = vmatprep.subr.mxu1 %v1344_v0 }
  0xf9   :  { %1110 = vmatpush3.msra.mxu1 %v1400_v3 }
  0xfa   :  { %1111 = vmatprep.subr.mxu1 %v1344_v0 }
  0xfb   :  { %1112 = vmatpush3.msra.mxu1 %v1409_v4 }
  0xfc   :  { %1113 = vmatprep.subr.mxu1 %v1344_v0 }
  0xfd   :  { %1114 = vmatpush3.msra.mxu1 %v1418_v5 }
  0xfe   :  { %1115 = vmatprep.subr.mxu1 %v1344_v0 }
  0xff   :  { %1116 = vmatpush3.msra.mxu1 %v1427_v6 }
 0x100   :  { %1117 = vmatprep.subr.mxu1 %v1344_v0 }
 0x101   :  { %1118 = vmatpush3.msra.mxu1 %v1436_v7 }
 0x102   :  { %1119 = vmatprep.subr.mxu1 %v1344_v0 }
 0x103   :  { %1120 = vmatpush3.msra.mxu1 %v1445_v8 }
 0x104   :  { %1121 = vmatprep.subr.mxu1 %v1344_v0 }
 0x105   :  { %1122 = vmatpush3.msra.mxu1 %v1459_v10 }
 0x106   :  { %1123 = vmatprep.subr.mxu1 %v1344_v0 }
 0x107   :  { %1124 = vmatpush3.msra.mxu1 %v1468_v11 }
 0x108   :  { %1125 = vmatprep.subr.mxu1 %v1344_v0 }
 0x109   :  { %1126 = vmatpush3.msra.mxu1 %v1478_v12 }
 0x10a   :  { %1127 = vmatprep.subr.mxu1 %v1344_v0 }
 0x10b   :  { %1128 = vmatpush3.msra.mxu1 %v1487_v13 }
 0x10c   :  { %1129 = vmatprep.subr.mxu1 %v1344_v0 }
 0x10d   :  { %1130 = vmatpush3.msra.mxu1 %v1496_v14 }
 0x10e   :  { %1131 = vmatprep.subr.mxu1 %v1344_v0 }
 0x10f   :  { %1132 = vmatpush3.msra.mxu1 %v1505_v15 }
 0x110   :  { %1133 = vmatprep.subr.mxu1 %v1344_v0 }
 0x111   :  { %1134 = vmatpush3.msra.mxu1 %v1514_v16 }
 0x112   :  { %1135 = vmatprep.subr.mxu1 %v1344_v0 }
 0x113   :  { %1136 = vmatpush3.msra.mxu1 %v1523_v17 }
 0x114   :  { %1175 = vmatprep.subr.mxu1 %v1344_v0 }
 0x1b4   :  { %v191_v27 = vpop.f32.mrf.mxu1 }
 0x1b5   :  { %v196_v29 = vadd.f32 %v195_v26, %v191_v27 }
 0x1b6   :  { %v1069_v30 = vpop.f32.mrf.mxu1 }
 0x1b7   :  { %v199_v31 = vadd.f32 %v825_v28, %v196_v29 }
 0x1b9   :  { %1330 = vtanh.f32 %v199_v31  ;;  %v273_v33 = vmul.f32 0.9, %v199_v31 }
 0x1c6   :  { %v1619_v32 = vpop.eup %1330 }
 0x1c7   :  { %826 = vst [vmem:[%s1891_s6 + $0x8] sm:$0xff] %v1619_v32  ;;  %1103 = vmatmul.mubr.f32.vlgmr.msra.gmra.mxu0 %v1619_v32 }
 0x1c8   :  { %1141 = vmatpush3.msra.mxu0 %v1385_v1  ;;  %1172 = vmatprep.mubr.msk.f32.mxu0 %vm1345_vm0, %v1344_v0 }
 0x1c9   :  { %1142 = vmatprep.subr.mxu0 %v1344_v0 }
 0x1ca   :  { %1143 = vmatpush3.msra.mxu0 %v1390_v2 }
 0x1cb   :  { %1144 = vmatprep.subr.mxu0 %v1344_v0 }
 0x1cc   :  { %1145 = vmatpush3.msra.mxu0 %v1400_v3 }
 0x1cd   :  { %1146 = vmatprep.subr.mxu0 %v1344_v0 }
 0x1ce   :  { %1147 = vmatpush3.msra.mxu0 %v1409_v4 }
 0x1cf   :  { %1148 = vmatprep.subr.mxu0 %v1344_v0 }
 0x1d0   :  { %1149 = vmatpush3.msra.mxu0 %v1418_v5 }
 0x1d1   :  { %1150 = vmatprep.subr.mxu0 %v1344_v0 }
 0x1d2   :  { %1151 = vmatpush3.msra.mxu0 %v1427_v6 }
 0x1d3   :  { %1152 = vmatprep.subr.mxu0 %v1344_v0 }
 0x1d4   :  { %1153 = vmatpush3.msra.mxu0 %v1436_v7 }
 0x1d5   :  { %1154 = vmatprep.subr.mxu0 %v1344_v0 }
 0x1d6   :  { %1155 = vmatpush3.msra.mxu0 %v1445_v8 }
 0x1d7   :  { %1156 = vmatprep.subr.mxu0 %v1344_v0 }
 0x1d8   :  { %1157 = vmatpush3.msra.mxu0 %v1459_v10 }
 0x1d9   :  { %1158 = vmatprep.subr.mxu0 %v1344_v0 }
 0x1da   :  { %1159 = vmatpush3.msra.mxu0 %v1468_v11 }
 0x1db   :  { %1160 = vmatprep.subr.mxu0 %v1344_v0 }
 0x1dc   :  { %1161 = vmatpush3.msra.mxu0 %v1478_v12 }
 0x1dd   :  { %1162 = vmatprep.subr.mxu0 %v1344_v0 }
 0x1de   :  { %1163 = vmatpush3.msra.mxu0 %v1487_v13 }
 0x1df   :  { %1164 = vmatprep.subr.mxu0 %v1344_v0 }
 0x1e0   :  { %1165 = vmatpush3.msra.mxu0 %v1496_v14 }
 0x1e1   :  { %1166 = vmatprep.subr.mxu0 %v1344_v0 }
 0x1e2   :  { %1167 = vmatpush3.msra.mxu0 %v1505_v15 }
 0x1e3   :  { %1168 = vmatprep.subr.mxu0 %v1344_v0 }
 0x1e4   :  { %1169 = vmatpush3.msra.mxu0 %v1514_v16 }
 0x1e5   :  { %1170 = vmatprep.subr.mxu0 %v1344_v0 }
 0x1e6   :  { %1171 = vmatpush3.msra.mxu0 %v1523_v17 }
 0x1e7   :  { %1210 = vmatprep.subr.mxu0 %v1344_v0 }
 0x287   :  { %v269_v34 = vpop.f32.mrf.mxu0 }
 0x288   :  { %v274_v36 = vadd.f32 %v273_v33, %v269_v34 }
 0x289   :  { %v1104_v37 = vpop.f32.mrf.mxu0 }
 0x28a   :  { %v277_v38 = vadd.f32 %v827_v35, %v274_v36  ;;  %v837_v35 = vld [vmem:[%s1890_s0 + $0x38] sm:$0xff] }
 0x28c   :  { %1332 = vtanh.f32 %v277_v38  ;;  %v351_v40 = vmul.f32 0.9, %v277_v38 }
 0x299   :  { %v1663_v39 = vpop.eup %1332 }
 0x29a   :  { %828 = vst [vmem:[%s1891_s6 + $0x10] sm:$0xff] %v1663_v39  ;;  %1138 = vmatmul.mubr.f32.vlgmr.msra.gmra.mxu1 %v1663_v39 }
 0x29b   :  { %1176 = vmatpush3.msra.mxu1 %v1385_v1  ;;  %1207 = vmatprep.mubr.msk.f32.mxu1 %vm1345_vm0, %v1344_v0 }
 0x29c   :  { %1177 = vmatprep.subr.mxu1 %v1344_v0 }
 0x29d   :  { %1178 = vmatpush3.msra.mxu1 %v1390_v2 }
 0x29e   :  { %1179 = vmatprep.subr.mxu1 %v1344_v0 }
 0x29f   :  { %1180 = vmatpush3.msra.mxu1 %v1400_v3 }
 0x2a0   :  { %1181 = vmatprep.subr.mxu1 %v1344_v0 }
 0x2a1   :  { %1182 = vmatpush3.msra.mxu1 %v1409_v4 }
 0x2a2   :  { %1183 = vmatprep.subr.mxu1 %v1344_v0 }
 0x2a3   :  { %1184 = vmatpush3.msra.mxu1 %v1418_v5 }
 0x2a4   :  { %1185 = vmatprep.subr.mxu1 %v1344_v0 }
 0x2a5   :  { %1186 = vmatpush3.msra.mxu1 %v1427_v6 }
 0x2a6   :  { %1187 = vmatprep.subr.mxu1 %v1344_v0 }
 0x2a7   :  { %1188 = vmatpush3.msra.mxu1 %v1436_v7 }
 0x2a8   :  { %1189 = vmatprep.subr.mxu1 %v1344_v0 }
 0x2a9   :  { %1190 = vmatpush3.msra.mxu1 %v1445_v8 }
 0x2aa   :  { %1191 = vmatprep.subr.mxu1 %v1344_v0 }
 0x2ab   :  { %1192 = vmatpush3.msra.mxu1 %v1459_v10 }
 0x2ac   :  { %1193 = vmatprep.subr.mxu1 %v1344_v0 }
 0x2ad   :  { %1194 = vmatpush3.msra.mxu1 %v1468_v11 }
 0x2ae   :  { %1195 = vmatprep.subr.mxu1 %v1344_v0 }
 0x2af   :  { %1196 = vmatpush3.msra.mxu1 %v1478_v12 }
 0x2b0   :  { %1197 = vmatprep.subr.mxu1 %v1344_v0 }
 0x2b1   :  { %1198 = vmatpush3.msra.mxu1 %v1487_v13 }
 0x2b2   :  { %1199 = vmatprep.subr.mxu1 %v1344_v0 }
 0x2b3   :  { %1200 = vmatpush3.msra.mxu1 %v1496_v14 }
 0x2b4   :  { %1201 = vmatprep.subr.mxu1 %v1344_v0 }
 0x2b5   :  { %1202 = vmatpush3.msra.mxu1 %v1505_v15 }
 0x2b6   :  { %1203 = vmatprep.subr.mxu1 %v1344_v0 }
 0x2b7   :  { %1204 = vmatpush3.msra.mxu1 %v1514_v16 }
 0x2b8   :  { %1205 = vmatprep.subr.mxu1 %v1344_v0 }
 0x2b9   :  { %1206 = vmatpush3.msra.mxu1 %v1523_v17 }
 0x2ba   :  { %1245 = vmatprep.subr.mxu1 %v1344_v0 }
 0x35a   :  { %v347_v41 = vpop.f32.mrf.mxu1 }
 0x35b   :  { %v352_v43 = vadd.f32 %v351_v40, %v347_v41 }
 0x35c   :  { %v1139_v44 = vpop.f32.mrf.mxu1 }
 0x35d   :  { %v355_v45 = vadd.f32 %v829_v42, %v352_v43 }
 0x35f   :  { %1334 = vtanh.f32 %v355_v45  ;;  %v429_v47 = vmul.f32 0.9, %v355_v45 }
 0x36c   :  { %v1707_v46 = vpop.eup %1334 }
 0x36d   :  { %830 = vst [vmem:[%s1891_s6 + $0x18] sm:$0xff] %v1707_v46  ;;  %1173 = vmatmul.mubr.f32.vlgmr.msra.gmra.mxu0 %v1707_v46 }
 0x36e   :  { %1211 = vmatpush3.msra.mxu0 %v1385_v1  ;;  %1242 = vmatprep.mubr.msk.f32.mxu0 %vm1345_vm0, %v1344_v0 }
 0x36f   :  { %1212 = vmatprep.subr.mxu0 %v1344_v0 }
 0x370   :  { %1213 = vmatpush3.msra.mxu0 %v1390_v2 }
 0x371   :  { %1214 = vmatprep.subr.mxu0 %v1344_v0 }
 0x372   :  { %1215 = vmatpush3.msra.mxu0 %v1400_v3 }
 0x373   :  { %1216 = vmatprep.subr.mxu0 %v1344_v0 }
 0x374   :  { %1217 = vmatpush3.msra.mxu0 %v1409_v4 }
 0x375   :  { %1218 = vmatprep.subr.mxu0 %v1344_v0 }
 0x376   :  { %1219 = vmatpush3.msra.mxu0 %v1418_v5 }
 0x377   :  { %1220 = vmatprep.subr.mxu0 %v1344_v0 }
 0x378   :  { %1221 = vmatpush3.msra.mxu0 %v1427_v6 }
 0x379   :  { %1222 = vmatprep.subr.mxu0 %v1344_v0 }
 0x37a   :  { %1223 = vmatpush3.msra.mxu0 %v1436_v7 }
 0x37b   :  { %1224 = vmatprep.subr.mxu0 %v1344_v0 }
 0x37c   :  { %1225 = vmatpush3.msra.mxu0 %v1445_v8 }
 0x37d   :  { %1226 = vmatprep.subr.mxu0 %v1344_v0 }
 0x37e   :  { %1227 = vmatpush3.msra.mxu0 %v1459_v10 }
 0x37f   :  { %1228 = vmatprep.subr.mxu0 %v1344_v0 }
 0x380   :  { %1229 = vmatpush3.msra.mxu0 %v1468_v11 }
 0x381   :  { %1230 = vmatprep.subr.mxu0 %v1344_v0 }
 0x382   :  { %1231 = vmatpush3.msra.mxu0 %v1478_v12 }
 0x383   :  { %1232 = vmatprep.subr.mxu0 %v1344_v0 }
 0x384   :  { %1233 = vmatpush3.msra.mxu0 %v1487_v13 }
 0x385   :  { %1234 = vmatprep.subr.mxu0 %v1344_v0 }
 0x386   :  { %1235 = vmatpush3.msra.mxu0 %v1496_v14 }
 0x387   :  { %1236 = vmatprep.subr.mxu0 %v1344_v0 }
 0x388   :  { %1237 = vmatpush3.msra.mxu0 %v1505_v15 }
 0x389   :  { %1238 = vmatprep.subr.mxu0 %v1344_v0 }
 0x38a   :  { %1239 = vmatpush3.msra.mxu0 %v1514_v16 }
 0x38b   :  { %1240 = vmatprep.subr.mxu0 %v1344_v0 }
 0x38c   :  { %1241 = vmatpush3.msra.mxu0 %v1523_v17 }
 0x38d   :  { %1280 = vmatprep.subr.mxu0 %v696_v54 }
 0x42d   :  { %v425_v48 = vpop.f32.mrf.mxu0 }
 0x42e   :  { %v430_v50 = vadd.f32 %v429_v47, %v425_v48 }
 0x42f   :  { %v1174_v51 = vpop.f32.mrf.mxu0 }
 0x430   :  { %v433_v52 = vadd.f32 %v831_v49, %v430_v50 }
 0x432   :  { %1336 = vtanh.f32 %v433_v52  ;;  %v507_v55 = vmul.f32 0.9, %v433_v52 }
 0x43f   :  { %v1750_v53 = vpop.eup %1336 }
 0x440   :  { %832 = vst [vmem:[%s1891_s6 + $0x20] sm:$0xff] %v1750_v53  ;;  %1208 = vmatmul.mubr.f32.vlgmr.msra.gmra.mxu1 %v1750_v53 }
 0x441   :  { %1246 = vmatpush3.msra.mxu1 %v1385_v1  ;;  %1277 = vmatprep.mubr.msk.f32.mxu1 %vm1345_vm0, %v1344_v0  ;;  %v692_v1 = vld [vmem:[%s1892_s3 + $0x58] sm:$0xff] }
 0x442   :  { %1247 = vmatprep.subr.mxu1 %v1344_v0 }
 0x443   :  { %1248 = vmatpush3.msra.mxu1 %v1390_v2  ;;  %v691_v2 = vld [vmem:[%s1892_s3 + $0x50] sm:$0xff] }
 0x444   :  { %1249 = vmatprep.subr.mxu1 %v1344_v0 }
 0x445   :  { %1250 = vmatpush3.msra.mxu1 %v1400_v3  ;;  %v690_v3 = vld [vmem:[%s1892_s3 + $0x48] sm:$0xff] }
 0x446   :  { %1251 = vmatprep.subr.mxu1 %v1344_v0 }
 0x447   :  { %1252 = vmatpush3.msra.mxu1 %v1409_v4  ;;  %v689_v4 = vld [vmem:[%s1892_s3 + $0x40] sm:$0xff] }
 0x448   :  { %1253 = vmatprep.subr.mxu1 %v1344_v0 }
 0x449   :  { %1254 = vmatpush3.msra.mxu1 %v1418_v5  ;;  %v688_v5 = vld [vmem:[%s1892_s3 + $0x38] sm:$0xff] }
 0x44a   :  { %1255 = vmatprep.subr.mxu1 %v1344_v0 }
 0x44b   :  { %1256 = vmatpush3.msra.mxu1 %v1427_v6  ;;  %v687_v6 = vld [vmem:[%s1892_s3 + $0x30] sm:$0xff] }
 0x44c   :  { %1257 = vmatprep.subr.mxu1 %v1344_v0 }
 0x44d   :  { %1258 = vmatpush3.msra.mxu1 %v1436_v7  ;;  %v686_v7 = vld [vmem:[%s1892_s3 + $0x28] sm:$0xff] }
 0x44e   :  { %1259 = vmatprep.subr.mxu1 %v1344_v0 }
 0x44f   :  { %1260 = vmatpush3.msra.mxu1 %v1445_v8  ;;  %v685_v8 = vld [vmem:[%s1892_s3 + $0x20] sm:$0xff] }
 0x450   :  { %1261 = vmatprep.subr.mxu1 %v1344_v0 }
 0x451   :  { %1262 = vmatpush3.msra.mxu1 %v1459_v10  ;;  %v683_v10 = vld [vmem:[%s1892_s3 + $0x10] sm:$0xff] }
 0x452   :  { %1263 = vmatprep.subr.mxu1 %v1344_v0 }
 0x453   :  { %1264 = vmatpush3.msra.mxu1 %v1468_v11  ;;  %v682_v11 = vld [vmem:[%s1892_s3 + $0x8] sm:$0xff] }
 0x454   :  { %1265 = vmatprep.subr.mxu1 %v1344_v0 }
 0x455   :  { %1266 = vmatpush3.msra.mxu1 %v1478_v12  ;;  %v681_v12 = vld [vmem:[%s1892_s3] sm:$0xff] }
 0x456   :  { %1267 = vmatprep.subr.mxu1 %v1344_v0 }
 0x457   :  { %1268 = vmatpush3.msra.mxu1 %v1487_v13 }
 0x458   :  { %1269 = vmatprep.subr.mxu1 %v1344_v0 }
 0x459   :  { %1270 = vmatpush3.msra.mxu1 %v1496_v14 }
 0x45a   :  { %1271 = vmatprep.subr.mxu1 %v1344_v0 }
 0x45b   :  { %1272 = vmatpush3.msra.mxu1 %v1505_v15  ;;  %v835_v15 = vld [vmem:[%s1890_s0 + $0x30] sm:$0xff] }
 0x45c   :  { %1273 = vmatprep.subr.mxu1 %v1344_v0 }
 0x45d   :  { %1274 = vmatpush3.msra.mxu1 %v1514_v16 }
 0x45e   :  { %1275 = vmatprep.subr.mxu1 %v1344_v0  ;;  %v693_v0 = vld [vmem:[%s1892_s3 + $0x60] sm:$0xff] }
 0x45f   :  { %1276 = vmatpush3.msra.mxu1 %v1523_v17 }
 0x500   :  { %v503_v56 = vpop.f32.mrf.mxu1 }
 0x501   :  { %v508_v58 = vadd.f32 %v507_v55, %v503_v56 }
 0x502   :  { %v1209_v59 = vpop.f32.mrf.mxu1 }
 0x503   :  { %v511_v60 = vadd.f32 %v833_v57, %v508_v58 }
 0x505   :  { %1338 = vtanh.f32 %v511_v60  ;;  %v585_v13 = vmul.f32 0.9, %v511_v60 }
 0x512   :  { %v1339_v61 = vpop.eup %1338 }
 0x513   :  { %834 = vst [vmem:[%s1891_s6 + $0x28] sm:$0xff] %v1339_v61  ;;  %1243 = vmatmul.mubr.f32.vlgmr.msra.gmra.mxu0 %v1339_v61 }
 0x514   :  { %1281 = vmatpush3.msra.mxu0 %v696_v54  ;;  %1312 = vmatprep.mubr.f32.mxu0 %v1575_v25 }
 0x515   :  { %1282 = vmatprep.subr.mxu0 %v695_v62 }
 0x516   :  { %1283 = vmatpush3.msra.mxu0 %v695_v62 }
 0x517   :  { %1284 = vmatprep.subr.mxu0 %v694_v63 }
 0x518   :  { %1285 = vmatpush3.msra.mxu0 %v694_v63 }
 0x519   :  { %1286 = vmatprep.subr.mxu0 %v693_v0 }
 0x51a   :  { %1287 = vmatpush3.msra.mxu0 %v693_v0 }
 0x51b   :  { %1288 = vmatprep.subr.mxu0 %v692_v1 }
 0x51c   :  { %1289 = vmatpush3.msra.mxu0 %v692_v1 }
 0x51d   :  { %1290 = vmatprep.subr.mxu0 %v691_v2 }
 0x51e   :  { %1291 = vmatpush3.msra.mxu0 %v691_v2 }
 0x51f   :  { %1292 = vmatprep.subr.mxu0 %v690_v3 }
 0x520   :  { %1293 = vmatpush3.msra.mxu0 %v690_v3 }
 0x521   :  { %1294 = vmatprep.subr.mxu0 %v689_v4 }
 0x522   :  { %1295 = vmatpush3.msra.mxu0 %v689_v4 }
 0x523   :  { %1296 = vmatprep.subr.mxu0 %v688_v5 }
 0x524   :  { %1297 = vmatpush3.msra.mxu0 %v688_v5 }
 0x525   :  { %1298 = vmatprep.subr.mxu0 %v687_v6 }
 0x526   :  { %1299 = vmatpush3.msra.mxu0 %v687_v6 }
 0x527   :  { %1300 = vmatprep.subr.mxu0 %v686_v7 }
 0x528   :  { %1301 = vmatpush3.msra.mxu0 %v686_v7 }
 0x529   :  { %1302 = vmatprep.subr.mxu0 %v685_v8 }
 0x52a   :  { %1303 = vmatpush3.msra.mxu0 %v685_v8 }
 0x52b   :  { %1304 = vmatprep.subr.mxu0 %v684_v9 }
 0x52c   :  { %1305 = vmatpush3.msra.mxu0 %v684_v9 }
 0x52d   :  { %1306 = vmatprep.subr.mxu0 %v683_v10 }
 0x52e   :  { %1307 = vmatpush3.msra.mxu0 %v683_v10 }
 0x52f   :  { %1308 = vmatprep.subr.mxu0 %v682_v11 }
 0x530   :  { %1309 = vmatpush3.msra.mxu0 %v682_v11 }
 0x531   :  { %1310 = vmatprep.subr.mxu0 %v681_v12 }
 0x532   :  { %1311 = vmatpush3.msra.mxu0 %v681_v12 }
 0x533   :  { %1313 = vmatmul.mubr.f32.vlgmr.msra.gmra.mxu0 %v1619_v32 }
 0x534   :  { %1315 = vmatprep.mubr.f32.mxu0 %v1663_v39 }
 0x537   :  { %1316 = vmatmul.mubr.f32.gmra.mxu0 %v1707_v46 }
 0x538   :  { %1318 = vmatprep.mubr.f32.mxu0 %v1750_v53 }
 0x53b   :  { %1319 = vmatmul.mubr.f32.gmra.mxu0 %v1339_v61 }
 0x5d3   :  { %v581_v14 = vpop.f32.mrf.mxu0 }
 0x5d4   :  { %v586_v16 = vadd.f32 %v585_v13, %v581_v14 }
 0x5d5   :  { %v1244_v17 = vpop.f32.mrf.mxu0 }
 0x5d6   :  { %v589_v18 = vadd.f32 %v835_v15, %v586_v16 }
 0x5d8   :  { %1340 = vtanh.f32 %v589_v18  ;;  %v663_v33 = vmul.f32 0.9, %v589_v18 }
 0x5e5   :  { %v1341_v19 = vpop.eup %1340 }
 0x5e6   :  { %836 = vst [vmem:[%s1891_s6 + $0x30] sm:$0xff] %v1341_v19  ;;  %1278 = vmatmul.mubr.f32.vlgmr.msra.gmra.mxu1 %v1341_v19  ;;  %1321 = vmatprep.mubr.f32.mxu0 %v1341_v19 }
 0x5f3   :  { %v1314_v21 = vpop.f32.mrf.mxu0 }
 0x5f4   :  { %v776_v22 = vadd.f32 %v1314_v21, %v839_v20 }
 0x5f5   :  { %v770_v23 = vpop.f32.mrf.mxu0 }
 0x5f6   :  { %810 = vst [vmem:[%s1894_s5 + $0x8] sm:$0xff] %v776_v22  ;;  %v771_v24 = vadd.f32 %v839_v20, %v770_v23 }
 0x5f7   :  { %v1317_v25 = vpop.f32.mrf.mxu0 }
 0x5f8   :  { %809 = vst [vmem:[%s1894_s5] sm:$0xff] %v771_v24  ;;  %v786_v26 = vadd.f32 %v1317_v25, %v839_v20 }
 0x5f9   :  { %v780_v27 = vpop.f32.mrf.mxu0 }
 0x5fa   :  { %812 = vst [vmem:[%s1894_s5 + $0x18] sm:$0xff] %v786_v26  ;;  %v781_v28 = vadd.f32 %v839_v20, %v780_v27 }
 0x5fb   :  { %v1320_v29 = vpop.f32.mrf.mxu0 }
 0x5fc   :  { %811 = vst [vmem:[%s1894_s5 + $0x10] sm:$0xff] %v781_v28  ;;  %v796_v30 = vadd.f32 %v1320_v29, %v839_v20 }
 0x5fd   :  { %v790_v31 = vpop.f32.mrf.mxu0 }
 0x5fe   :  { %814 = vst [vmem:[%s1894_s5 + $0x28] sm:$0xff] %v796_v30  ;;  %v791_v32 = vadd.f32 %v839_v20, %v790_v31 }
 0x600   :  { %813 = vst [vmem:[%s1894_s5 + $0x20] sm:$0xff] %v791_v32 }
 0x6a6   :  { %v659_v34 = vpop.f32.mrf.mxu1 }
 0x6a7   :  { %v664_v36 = vadd.f32 %v663_v33, %v659_v34 }
 0x6a8   :  { %v1279_v37 = vpop.f32.mrf.mxu1 }
 0x6a9   :  { %v667_v38 = vadd.f32 %v837_v35, %v664_v36 }
 0x6ab   :  { %1342 = vtanh.f32 %v667_v38 }
 0x6b8   :  { %v1343_v39 = vpop.eup %1342 }
 0x6b9   :  { %838 = vst [vmem:[%s1891_s6 + $0x38] sm:$0xff] %v1343_v39  ;;  %1322 = vmatmul.mubr.f32.gmra.mxu0 %v1343_v39 }
 0x779   :  { %v1323_v40 = vpop.f32.mrf.mxu0 }
 0x77a   :  { %v806_v41 = vadd.f32 %v1323_v40, %v839_v20 }
 0x77b   :  { %v800_v42 = vpop.f32.mrf.mxu0 }
 0x77c   :  { %816 = vst [vmem:[%s1894_s5 + $0x38] sm:$0xff] %v806_v41  ;;  %v801_v43 = vadd.f32 %v839_v20, %v800_v42 }
 0x77e   :  { %815 = vst [vmem:[%s1894_s5 + $0x30] sm:$0xff] %v801_v43 }

</bundles_post_ra>
